<compile_context>
chip_gen: v5e
topology: v5e:2x2
jax: 0.10.0
libtpu: 0.0.40
codegen_flags: <defaults>
</compile_context>

<pallas_src>
import functools

import jax
import jax.numpy as jnp
from jax.experimental import pallas as pl
from jax.experimental.pallas import tpu as pltpu

_OUT_LANES = 128  # lane-dense partial-sum output (3 lanes used, rest zero)


def _round_up(x, m):
    return (x + m - 1) // m * m


def _device_budgets():
    """(per-input streamed block bytes, scoped vmem limit bytes or None)."""
    kind = ""
    try:
        kind = jax.devices()[0].device_kind.lower()
    except Exception:  # pragma: no cover - defensive
        pass
    if "v7" in kind:
        # v7x: only 64 MiB VMEM per TensorCore -> smaller blocks, tight limit.
        return 2 * 1024 * 1024, 40 * 1024 * 1024
    if any(v in kind for v in ("v4", "v5", "v6")):
        # 128 MiB VMEM -> large blocks (85%+ of HBM roofline regime).
        return 4 * 1024 * 1024, 80 * 1024 * 1024
    # Unknown chip: conservative blocks, keep default scoped limit.
    return 1 * 1024 * 1024, None


def _blkd_tile_kernel(s_ref, t_ref, tgt_ref, w_ref, out_ref, *, inv_t, batch):
    """One (TB, C) batch tile -> partial sums (ce_numerator, weight_denom, kd_sum)."""
    i = pl.program_id(0)
    tb, c = s_ref.shape

    s = s_ref[...].astype(jnp.float32)      # (TB, C) upcast in-kernel only
    t = t_ref[...].astype(jnp.float32)      # (TB, C)
    tgt = tgt_ref[...]                      # (TB, 1) int32
    w = w_ref[...].astype(jnp.float32)      # (1, C)

    # Row-validity mask for the (possibly partial) last batch tile.
    row_ids = i * tb + jax.lax.broadcasted_iota(jnp.int32, (tb, 1), 0)
    row_ok = row_ids < batch                                          # (TB, 1)

    # ---------------- weighted cross-entropy (per-row gathers) ---------------
    class_ids = jax.lax.broadcasted_iota(jnp.int32, (tb, c), 1)
    onehot = class_ids == tgt                                         # (TB, C)
    s_tgt = jnp.sum(jnp.where(onehot, s, 0.0), axis=1, keepdims=True)  # (TB,1)
    w_tgt = jnp.sum(jnp.where(onehot, w, 0.0), axis=1, keepdims=True)  # (TB,1)

    m_s = jnp.max(s, axis=1, keepdims=True)                           # (TB, 1)
    lse_s = jnp.log(jnp.sum(jnp.exp(s - m_s), axis=1, keepdims=True)) + m_s
    ce_row = w_tgt * (lse_s - s_tgt)                                  # (TB, 1)

    # ---------------- KL distillation (per-row closed form) ------------------
    # student tempered lse: reuse m_s (max is order-preserving under 1/T > 0)
    sum_st = jnp.sum(jnp.exp((s - m_s) * inv_t), axis=1, keepdims=True)
    # teacher tempered softmax
    m_t = jnp.max(t, axis=1, keepdims=True)
    e_tt = jnp.exp((t - m_t) * inv_t)                                 # (TB, C)
    sum_tt = jnp.sum(e_tt, axis=1, keepdims=True)                     # (TB, 1)
    a_row = jnp.sum(e_tt * (t - s), axis=1, keepdims=True)            # (TB, 1)

    # log_pt - log_ps = (t - s)*inv_t - d_row   (d_row is a per-row scalar)
    d_row = (m_t - m_s) * inv_t + jnp.log(sum_tt) - jnp.log(sum_st)
    # sum_c p_t * (log_pt - log_ps) = inv_t * a_row / sum_tt - d_row
    kd_row = inv_t * a_row * pl.reciprocal(sum_tt, approx=False) - d_row

    ce_num = jnp.sum(jnp.where(row_ok, ce_row, 0.0))
    w_den = jnp.sum(jnp.where(row_ok, w_tgt, 0.0))
    kd_sum = jnp.sum(jnp.where(row_ok, kd_row, 0.0))

    # ---------------- lane-dense partial output ------------------------------
    lane = jax.lax.broadcasted_iota(jnp.int32, (1, 8, _OUT_LANES), 2)
    out_ref[...] = jnp.where(lane == 0, ce_num,
                   jnp.where(lane == 1, w_den,
                   jnp.where(lane == 2, kd_sum, 0.0)))


def blkd_loss(logits_s, logits_t, target, weight, *, lambd=0.5, T=5.0):
    """Pallas-backed BLKD loss. logits: (B, C), target: (B,) int, weight: (C,)."""
    B, C = logits_s.shape
    itemsize = jnp.dtype(logits_s.dtype).itemsize
    # sublane granularity of the streamed dtype: 8 (f32), 16 (bf16), 32 (int8/fp8)
    gran = max(8, 32 // itemsize)

    blk_bytes, vmem_limit = _device_budgets()

    if B <= gran:
        tb = B                                  # single full-batch tile
    else:
        tb = max(gran, (blk_bytes // max(1, C * itemsize)) // gran * gran)
        # Ensure >= 2 grid tiles when possible (v7x dual-TC sharding, pipelining).
        tb = min(tb, _round_up(-(-B // 2), gran))
    num_tiles = -(-B // tb)

    tgt2d = target.astype(jnp.int32).reshape(B, 1)       # tiny
    w2d = weight.astype(jnp.float32).reshape(1, C)       # tiny, stays VMEM-resident

    kernel = functools.partial(_blkd_tile_kernel, inv_t=float(1.0 / T), batch=B)

    cost = pl.CostEstimate(
        flops=int(14 * B * C),
        transcendentals=int(3 * B * C + 4 * B),
        bytes_accessed=int(2 * B * C * itemsize + B * 4 + C * 4
                           + num_tiles * 8 * _OUT_LANES * 4),
    )

    cp_kwargs = dict(dimension_semantics=("parallel",))
    if vmem_limit is not None:
        cp_kwargs["vmem_limit_bytes"] = int(vmem_limit)

    # NOTE: if profiling shows exposed DMA in the small-block regime, try
    # pipeline_mode=pl.Buffered(3) on the two logits BlockSpecs.
    partials = pl.pallas_call(
        kernel,
        grid=(num_tiles,),
        out_shape=jax.ShapeDtypeStruct((num_tiles, 8, _OUT_LANES), jnp.float32),
        in_specs=[
            pl.BlockSpec((tb, C), lambda i: (i, 0)),      # logits_s, native dtype
            pl.BlockSpec((tb, C), lambda i: (i, 0)),      # logits_t, native dtype
            pl.BlockSpec((tb, 1), lambda i: (i, 0)),      # targets
            pl.BlockSpec((1, C), lambda i: (0, 0)),       # class weights (resident)
        ],
        out_specs=pl.BlockSpec((1, 8, _OUT_LANES), lambda i: (i, 0, 0)),
        compiler_params=pltpu.CompilerParams(**cp_kwargs),
        cost_estimate=cost,
    )(logits_s, logits_t, tgt2d, w2d)

    ce_num = jnp.sum(partials[:, 0, 0])
    w_den = jnp.sum(partials[:, 0, 1])
    kd_sum = jnp.sum(partials[:, 0, 2])

    loss_base = ce_num / w_den                 # PyTorch weighted-mean CE
    loss_kd = kd_sum / jnp.float32(B)          # KLDiv(sum) / batch_size
    return (1.0 - lambd) * loss_base + lambd * T * T * loss_kd


def _reference(logits_s, logits_t, target, weight, lambd=0.5, T=5.0):
    """Pure-JAX reference mirroring PyTorch semantics (sanity check)."""
    logits_s = logits_s.astype(jnp.float32)
    logits_t = logits_t.astype(jnp.float32)
    logp = jax.nn.log_softmax(logits_s, axis=1)
    ce = -jnp.take_along_axis(logp, target[:, None], axis=1)[:, 0]
    w = weight[target]
    loss_base = jnp.sum(w * ce) / jnp.sum(w)
    log_ps = jax.nn.log_softmax(logits_s / T, axis=1)
    log_pt = jax.nn.log_softmax(logits_t / T, axis=1)
    pt = jnp.exp(log_pt)
    loss_kd = jnp.sum(pt * (log_pt - log_ps)) / logits_s.shape[0]
    return (1.0 - lambd) * loss_base + lambd * T * T * loss_kd


if __name__ == "__main__":
    lambd, T = 0.5, 5.0

    # Primary small test (module-consistent shapes: B=8, C=16 classes).
    B, C = 8, 16
    key = jax.random.PRNGKey(0)
    k1, k2, k3 = jax.random.split(key, 3)
    logits_s = jax.random.normal(k1, (B, C), dtype=jnp.float32)
    logits_t = jax.random.normal(k2, (B, C), dtype=jnp.float32)
    target = jax.random.randint(k3, (B,), 0, C, dtype=jnp.int32)
    weight = jnp.linspace(0.5, 1.5, C, dtype=jnp.float32)

    loss = blkd_loss(logits_s, logits_t, target, weight, lambd=lambd, T=T)
    jax.block_until_ready(loss)
    ref = _reference(logits_s, logits_t, target, weight, lambd=lambd, T=T)
    assert jnp.allclose(loss, ref, rtol=1e-5, atol=1e-5), (loss, ref)

    # Ragged test: non-multiple-of-8 batch, non-multiple-of-128 classes ->
    # exercises the partial boundary tile + in-kernel row mask (no host padding).
    B2, C2 = 20, 40
    k4, k5, k6 = jax.random.split(jax.random.PRNGKey(1), 3)
    ls2 = jax.random.normal(k4, (B2, C2), dtype=jnp.float32)
    lt2 = jax.random.normal(k5, (B2, C2), dtype=jnp.float32)
    tg2 = jax.random.randint(k6, (B2,), 0, C2, dtype=jnp.int32)
    w2 = jnp.linspace(0.25, 2.0, C2, dtype=jnp.float32)

    loss2 = blkd_loss(ls2, lt2, tg2, w2, lambd=lambd, T=T)
    jax.block_until_ready(loss2)
    ref2 = _reference(ls2, lt2, tg2, w2, lambd=lambd, T=T)
    assert jnp.allclose(loss2, ref2, rtol=1e-5, atol=1e-5), (loss2, ref2)

    print("KERNEL_OK")
</pallas_src>

<mosaic_0001>
module attributes {stable_mosaic.version = 11 : i64} {
  func.func @_blkd_tile_kernel(%arg0: i32, %arg1: memref<8x16xf32, #tpu.memory_space<vmem>>, %arg2: memref<8x16xf32, #tpu.memory_space<vmem>>, %arg3: memref<8x1xi32, #tpu.memory_space<vmem>>, %arg4: memref<1x16xf32, #tpu.memory_space<vmem>>, %arg5: memref<1x8x128xf32, #tpu.memory_space<vmem>>) attributes {dimension_semantics = [#tpu.dimension_semantics<parallel>], iteration_bounds = array<i64: 1>, scalar_prefetch = 0 : i64, scratch_operands = 0 : i64, tpu.core_type = #tpu.core_type<tc>, window_params = [{transform_indices = @transform_0, window_bounds = array<i64: 8, 16>}, {transform_indices = @transform_1, window_bounds = array<i64: 8, 16>}, {transform_indices = @transform_2, window_bounds = array<i64: 8, 1>}, {pipeline_mode = #tpu.pipeline_mode<synchronous>, transform_indices = @transform_3, window_bounds = array<i64: 1, 16>}, {transform_indices = @transform_4, window_bounds = array<i64: 1, 8, 128>}]} {
    %c0 = arith.constant 0 : index
    %c0_0 = arith.constant 0 : index
    %0 = vector.load %arg1[%c0, %c0_0] : memref<8x16xf32, #tpu.memory_space<vmem>>, vector<8x16xf32>
    %c0_1 = arith.constant 0 : index
    %c0_2 = arith.constant 0 : index
    %1 = vector.load %arg2[%c0_1, %c0_2] : memref<8x16xf32, #tpu.memory_space<vmem>>, vector<8x16xf32>
    %c0_3 = arith.constant 0 : index
    %c0_4 = arith.constant 0 : index
    %2 = vector.load %arg3[%c0_3, %c0_4] : memref<8x1xi32, #tpu.memory_space<vmem>>, vector<8x1xi32>
    %c0_5 = arith.constant 0 : index
    %c0_6 = arith.constant 0 : index
    %3 = vector.load %arg4[%c0_5, %c0_6] : memref<1x16xf32, #tpu.memory_space<vmem>>, vector<1x16xf32>
    %c8_i32 = arith.constant 8 : i32
    %4 = arith.muli %arg0, %c8_i32 : i32
    %5 = tpu.iota {dimensions = array<i32: 0>} : vector<8x1xi32>
    %6 = vector.broadcast %4 : i32 to vector<8x1xi32>
    %7 = arith.addi %6, %5 : vector<8x1xi32>
    %c8_i32_7 = arith.constant 8 : i32
    %8 = vector.broadcast %c8_i32_7 : i32 to vector<8x1xi32>
    %9 = arith.cmpi slt, %7, %8 : vector<8x1xi32>
    %10 = tpu.iota {dimensions = array<i32: 1>} : vector<8x16xi32>
    %11 = vector.broadcast %2 : vector<8x1xi32> to vector<8x16xi32>
    %12 = arith.cmpi eq, %10, %11 : vector<8x16xi32>
    %cst = arith.constant 0.000000e+00 : f32
    %13 = vector.broadcast %cst : f32 to vector<8x16xf32>
    %14 = arith.select %12, %0, %13 : vector<8x16xi1>, vector<8x16xf32>
    %cst_8 = arith.constant dense<0.000000e+00> : vector<8xf32>
    %15 = vector.multi_reduction <add>, %14, %cst_8 [1] : vector<8x16xf32> to vector<8xf32>
    %16 = vector.shape_cast %15 : vector<8xf32> to vector<8x1xf32>
    %cst_9 = arith.constant 0.000000e+00 : f32
    %17 = vector.shape_cast %3 : vector<1x16xf32> to vector<1x16xf32>
    %18 = vector.broadcast %17 : vector<1x16xf32> to vector<8x16xf32>
    %19 = vector.broadcast %cst_9 : f32 to vector<8x16xf32>
    %20 = arith.select %12, %18, %19 : vector<8x16xi1>, vector<8x16xf32>
    %cst_10 = arith.constant dense<0.000000e+00> : vector<8xf32>
    %21 = vector.multi_reduction <add>, %20, %cst_10 [1] : vector<8x16xf32> to vector<8xf32>
    %22 = vector.shape_cast %21 : vector<8xf32> to vector<8x1xf32>
    %cst_11 = arith.constant dense<0xFF800000> : vector<8xf32>
    %23 = vector.multi_reduction <maximumf>, %0, %cst_11 [1] : vector<8x16xf32> to vector<8xf32>
    %24 = vector.shape_cast %23 : vector<8xf32> to vector<8x1xf32>
    %25 = vector.broadcast %24 : vector<8x1xf32> to vector<8x16xf32>
    %26 = arith.subf %0, %25 : vector<8x16xf32>
    %27 = math.exp %26 : vector<8x16xf32>
    %cst_12 = arith.constant dense<0.000000e+00> : vector<8xf32>
    %28 = vector.multi_reduction <add>, %27, %cst_12 [1] : vector<8x16xf32> to vector<8xf32>
    %29 = vector.shape_cast %28 : vector<8xf32> to vector<8x1xf32>
    %30 = math.log %29 : vector<8x1xf32>
    %31 = arith.addf %30, %24 : vector<8x1xf32>
    %32 = arith.subf %31, %16 : vector<8x1xf32>
    %33 = arith.mulf %22, %32 : vector<8x1xf32>
    %34 = vector.broadcast %24 : vector<8x1xf32> to vector<8x16xf32>
    %35 = arith.subf %0, %34 : vector<8x16xf32>
    %cst_13 = arith.constant 2.000000e-01 : f32
    %36 = vector.broadcast %cst_13 : f32 to vector<8x16xf32>
    %37 = arith.mulf %35, %36 : vector<8x16xf32>
    %38 = math.exp %37 : vector<8x16xf32>
    %cst_14 = arith.constant dense<0.000000e+00> : vector<8xf32>
    %39 = vector.multi_reduction <add>, %38, %cst_14 [1] : vector<8x16xf32> to vector<8xf32>
    %40 = vector.shape_cast %39 : vector<8xf32> to vector<8x1xf32>
    %cst_15 = arith.constant dense<0xFF800000> : vector<8xf32>
    %41 = vector.multi_reduction <maximumf>, %1, %cst_15 [1] : vector<8x16xf32> to vector<8xf32>
    %42 = vector.shape_cast %41 : vector<8xf32> to vector<8x1xf32>
    %43 = vector.broadcast %42 : vector<8x1xf32> to vector<8x16xf32>
    %44 = arith.subf %1, %43 : vector<8x16xf32>
    %cst_16 = arith.constant 2.000000e-01 : f32
    %45 = vector.broadcast %cst_16 : f32 to vector<8x16xf32>
    %46 = arith.mulf %44, %45 : vector<8x16xf32>
    %47 = math.exp %46 : vector<8x16xf32>
    %cst_17 = arith.constant dense<0.000000e+00> : vector<8xf32>
    %48 = vector.multi_reduction <add>, %47, %cst_17 [1] : vector<8x16xf32> to vector<8xf32>
    %49 = vector.shape_cast %48 : vector<8xf32> to vector<8x1xf32>
    %50 = arith.subf %1, %0 : vector<8x16xf32>
    %51 = arith.mulf %47, %50 : vector<8x16xf32>
    %cst_18 = arith.constant dense<0.000000e+00> : vector<8xf32>
    %52 = vector.multi_reduction <add>, %51, %cst_18 [1] : vector<8x16xf32> to vector<8xf32>
    %53 = vector.shape_cast %52 : vector<8xf32> to vector<8x1xf32>
    %54 = arith.subf %42, %24 : vector<8x1xf32>
    %cst_19 = arith.constant 2.000000e-01 : f32
    %55 = vector.broadcast %cst_19 : f32 to vector<8x1xf32>
    %56 = arith.mulf %54, %55 : vector<8x1xf32>
    %57 = math.log %49 : vector<8x1xf32>
    %58 = arith.addf %56, %57 : vector<8x1xf32>
    %59 = math.log %40 : vector<8x1xf32>
    %60 = arith.subf %58, %59 : vector<8x1xf32>
    %cst_20 = arith.constant 2.000000e-01 : f32
    %61 = vector.broadcast %cst_20 : f32 to vector<8x1xf32>
    %62 = arith.mulf %61, %53 : vector<8x1xf32>
    %63 = tpu.reciprocal %49 : vector<8x1xf32> -> vector<8x1xf32>
    %64 = arith.mulf %62, %63 : vector<8x1xf32>
    %65 = arith.subf %64, %60 : vector<8x1xf32>
    %cst_21 = arith.constant 0.000000e+00 : f32
    %66 = vector.broadcast %cst_21 : f32 to vector<8x1xf32>
    %67 = arith.select %9, %33, %66 : vector<8x1xi1>, vector<8x1xf32>
    %68 = vector.shape_cast %67 : vector<8x1xf32> to vector<1x8x1xf32>
    %cst_22 = arith.constant dense<0.000000e+00> : vector<1xf32>
    %69 = vector.multi_reduction <add>, %68, %cst_22 [1, 2] : vector<1x8x1xf32> to vector<1xf32>
    %70 = vector.shape_cast %69 : vector<1xf32> to vector<1x1x1xf32>
    %71 = vector.extract %70[0, 0, 0] : f32 from vector<1x1x1xf32>
    %cst_23 = arith.constant 0.000000e+00 : f32
    %72 = vector.broadcast %cst_23 : f32 to vector<8x1xf32>
    %73 = arith.select %9, %22, %72 : vector<8x1xi1>, vector<8x1xf32>
    %74 = vector.shape_cast %73 : vector<8x1xf32> to vector<1x8x1xf32>
    %cst_24 = arith.constant dense<0.000000e+00> : vector<1xf32>
    %75 = vector.multi_reduction <add>, %74, %cst_24 [1, 2] : vector<1x8x1xf32> to vector<1xf32>
    %76 = vector.shape_cast %75 : vector<1xf32> to vector<1x1x1xf32>
    %77 = vector.extract %76[0, 0, 0] : f32 from vector<1x1x1xf32>
    %cst_25 = arith.constant 0.000000e+00 : f32
    %78 = vector.broadcast %cst_25 : f32 to vector<8x1xf32>
    %79 = arith.select %9, %65, %78 : vector<8x1xi1>, vector<8x1xf32>
    %80 = vector.shape_cast %79 : vector<8x1xf32> to vector<1x8x1xf32>
    %cst_26 = arith.constant dense<0.000000e+00> : vector<1xf32>
    %81 = vector.multi_reduction <add>, %80, %cst_26 [1, 2] : vector<1x8x1xf32> to vector<1xf32>
    %82 = vector.shape_cast %81 : vector<1xf32> to vector<1x1x1xf32>
    %83 = vector.extract %82[0, 0, 0] : f32 from vector<1x1x1xf32>
    %84 = tpu.iota {dimensions = array<i32: 2>} : vector<1x8x128xi32>
    %c0_i32 = arith.constant 0 : i32
    %85 = vector.broadcast %c0_i32 : i32 to vector<1x8x128xi32>
    %86 = arith.cmpi eq, %84, %85 : vector<1x8x128xi32>
    %c1_i32 = arith.constant 1 : i32
    %87 = vector.broadcast %c1_i32 : i32 to vector<1x8x128xi32>
    %88 = arith.cmpi eq, %84, %87 : vector<1x8x128xi32>
    %c2_i32 = arith.constant 2 : i32
    %89 = vector.broadcast %c2_i32 : i32 to vector<1x8x128xi32>
    %90 = arith.cmpi eq, %84, %89 : vector<1x8x128xi32>
    %cst_27 = arith.constant 0.000000e+00 : f32
    %91 = vector.broadcast %83 : f32 to vector<1x8x128xf32>
    %92 = vector.broadcast %cst_27 : f32 to vector<1x8x128xf32>
    %93 = arith.select %90, %91, %92 : vector<1x8x128xi1>, vector<1x8x128xf32>
    %94 = vector.broadcast %77 : f32 to vector<1x8x128xf32>
    %95 = arith.select %88, %94, %93 : vector<1x8x128xi1>, vector<1x8x128xf32>
    %96 = vector.broadcast %71 : f32 to vector<1x8x128xf32>
    %97 = arith.select %86, %96, %95 : vector<1x8x128xi1>, vector<1x8x128xf32>
    %c0_28 = arith.constant 0 : index
    %c0_29 = arith.constant 0 : index
    %c0_30 = arith.constant 0 : index
    %98 = vector.load %arg5[%c0_28, %c0_29, %c0_30] : memref<1x8x128xf32, #tpu.memory_space<vmem>>, vector<1x8x128xf32>
    tpu.vector_store %arg5[%c0_28, %c0_29, %c0_30], %97 {strides = array<i32>} : memref<1x8x128xf32, #tpu.memory_space<vmem>>, vector<1x8x128xf32>,
    return
  }
  func.func @transform_0(%arg0: i32) -> (i32, i32) {
    %c0_i32 = arith.constant 0 : i32
    %c0_i32_0 = arith.constant 0 : i32
    return %arg0, %c0_i32 : i32, i32
  }
  func.func @transform_1(%arg0: i32) -> (i32, i32) {
    %c0_i32 = arith.constant 0 : i32
    %c0_i32_0 = arith.constant 0 : i32
    return %arg0, %c0_i32 : i32, i32
  }
  func.func @transform_2(%arg0: i32) -> (i32, i32) {
    %c0_i32 = arith.constant 0 : i32
    %c0_i32_0 = arith.constant 0 : i32
    return %arg0, %c0_i32 : i32, i32
  }
  func.func @transform_3(%arg0: i32) -> (i32, i32) {
    %c0_i32 = arith.constant 0 : i32
    %c0_i32_0 = arith.constant 0 : i32
    %c0_i32_1 = arith.constant 0 : i32
    return %c0_i32, %c0_i32_0 : i32, i32
  }
  func.func @transform_4(%arg0: i32) -> (i32, i32, i32) {
    %c0_i32 = arith.constant 0 : i32
    %c0_i32_0 = arith.constant 0 : i32
    %c0_i32_1 = arith.constant 0 : i32
    return %arg0, %c0_i32, %c0_i32_0 : i32, i32, i32
  }
}

</mosaic_0001>

<bundles_post_ra>
// kernel: tpu_custom_call.1
= control target key start
LH: loop header
LB: loop body
LE: loop exit
PB: predicated region body
PF: predicated region fallthrough
CT: control target
= control target key end

     0   :  { %9 = vsyncpa [#allocation3], 0  ;;  %s323_s0 = inlined_call_operand.vmem [shape: f32[8,16], index: 0, kind: input, shape index: {}]   ;;  %s324_s1 = inlined_call_operand.hbm [shape: f32[8,16], index: 1, kind: input, shape index: {}]   ;;  %s325_s2 = inlined_call_operand.vmem [shape: s32[8,1], index: 2, kind: input, shape index: {}]   ;;  %s326_s3 = inlined_call_operand.vmem [shape: f32[1,16], index: 3, kind: input, shape index: {}]   ;;  %s327_s4 = inlined_call_operand.hbm [shape: f32[1,8,128], index: 4, kind: output, shape index: {}]  }
   0x1   :  { %10 = vsyncpa [#allocation4], 0  ;;  %s18_s17 = sshll.u32 %s324_s1, 4  ;;  %s259_s18 = smov [#allocation2]   ;;  %s19_s17 = int_to_ptr.hbm [resolvable:$true] %s18_s17 }
   0x2   :  { %s20_s19 = sshll.u32 %s259_s18, 4  ;;  %s21_s19 = int_to_ptr.vmem [resolvable:$true] %s20_s19 }
   0x3   :  { %23 = dma.hbm_to_vmem [thread:$0]  %s19_s17, 128, %s21_s19, [#allocation3]  }
   0x4   :  { %255 = dma.done.wait [#allocation3], 128  }
   0x5   :  { %256 = vsyncadd [#allocation3], 4294967168  ;;  %v260_v0 = vmov 0   ;;  %vm49_vm0 = vcmask 130048   ;;  %v33_v1 = vld [vmem:[#allocation2] sm:$0xff]  ;;  %v42_v11 = vlaneseq  ;;  %vm121_vm2 = vcmask 7168  }
   0x6   :  { %190 = vset.pattern.permute.xlu1 %v260_v0  ;;  %191 = vset.pattern.permute.xlu0 %v260_v0  ;;  %v34_v2 = vld [vmem:[%s325_s2] sm:$0xff]  ;;  %v80_v3 = vsel %vm49_vm0, %v33_v1, -inf  ;;  %s261_s24 = smov [#allocation5]   ;;  %s171_s29 = sshll.u32 %s327_s4, 4  ;;  %s172_s29 = int_to_ptr.hbm [resolvable:$true] %s171_s29 }
   0x7   :  { %45 = vperm.xlu1 %190, %v34_v2   ;;  %81 = vmax.xlane.f32.xlu0 %v80_v3  ;;  %v32_v4 = vld [vmem:[%s323_s0] sm:$0xff]  ;;  %v301_v16 = vand.u32 127, %v42_v11  ;;  %s169_s25 = sshll.u32 %s261_s24, 4  ;;  %s170_s25 = int_to_ptr.vmem [resolvable:$true] %s169_s25 }
   0x8   :  { %v60_v5 = vsel %vm49_vm0, %v32_v4, -inf  ;;  %v90_v13 = vsub.f32 %v33_v1, %v32_v4  ;;  %v192_v22 = vld [vmem:[%s326_s3] ss:$0 sm:$0xff] }
   0x9   :  { %vm156_vm7 = vcmp.eq.s32.totalorder %v301_v16, 2  ;;  %vm155_vm8 = vcmp.eq.s32.totalorder %v301_v16, 1  ;;  %vm154_vm9 = vcmp.eq.s32.totalorder %v301_v16, 0 }
   0xf   :  { %61 = vmax.xlane.f32.xlu0 %v60_v5 }
  0x79   :  { %v46_v18 = vpop.permute.xlu1 %45 }
  0x7a   :  { %v298_v6 = vpop.xlane.xlu0 %81  ;;  %vm47_vm1 = vcmp.eq.s32.totalorder %v301_v16, %v46_v18 }
  0x7b   :  { %v83_v7 = vsub.f32 %v33_v1, %v298_v6  ;;  %v56_v25 = vsel %vm47_vm1, %v192_v22, 0.0  ;;  %v48_v30 = vsel %vm47_vm1, %v32_v4, 0.0 }
  0x7c   :  { %v57_v27 = vsel %vm49_vm0, %v56_v25, 0.0  ;;  %v50_v31 = vsel %vm49_vm0, %v48_v30, 0.0 }
  0x7d   :  { %v84_v8 = vmul.f32 0.2, %v83_v7 }
  0x7f   :  { %v85_v9 = vmul.f32 1.442695, %v84_v8 }
  0x81   :  { %193 = vpow2.f32 %v85_v9 }
  0x82   :  { %v62_v10 = vpop.xlane.xlu0 %61 }
  0x83   :  { %v63_v12 = vsub.f32 %v32_v4, %v62_v10  ;;  %v95_v45 = vsub.f32 %v298_v6, %v62_v10 }
  0x85   :  { %v64_v14 = vmul.f32 1.442695, %v63_v12  ;;  %v74_v15 = vmul.f32 0.2, %v63_v12  ;;  %v96_v53 = vmul.f32 0.2, %v95_v45 }
  0x87   :  { %v194_v17 = vpop.eup %193  ;;  %195 = vpow2.f32 %v64_v14  ;;  %v75_v21 = vmul.f32 1.442695, %v74_v15 }
  0x88   :  { %v87_v19 = vsel %vm49_vm0, %v194_v17, 0.0  ;;  %v91_v20 = vmul.f32 %v194_v17, %v90_v13 }
  0x89   :  { %88 = vadd.xlane.f32.xlu1 %v87_v19  ;;  %197 = vpow2.f32 %v75_v21 }
  0x8a   :  { %v92_v23 = vsel %vm49_vm0, %v91_v20, 0.0 }
  0x8b   :  { %93 = vadd.xlane.f32.xlu0 %v92_v23 }
  0x8d   :  { %v196_v24 = vpop.eup %195 }
  0x8e   :  { %v66_v26 = vsel %vm49_vm0, %v196_v24, 0.0 }
  0x8f   :  { %67 = vadd.xlane.f32.xlu2 %v66_v26  ;;  %v198_v28 = vpop.eup %197 }
  0x90   :  { %v77_v29 = vsel %vm49_vm0, %v198_v28, 0.0 }
  0x93   :  { %58 = vadd.xlane.f32.xlu0 %v57_v27 }
  0x97   :  { %78 = vadd.xlane.f32.xlu2 %v77_v29 }
  0x9f   :  { %51 = vadd.xlane.f32.xlu2 %v50_v31 }
  0xfc   :  { %v89_v32 = vpop.xlane.xlu1 %88 }
  0xfd   :  { %199 = vrcp.f32 %v89_v32  ;;  %v115_v47 = vand.u32 2147483648, %v89_v32  ;;  %vm109_vm4 = vweird.f32 %v89_v32  ;;  %v113_v49 = vand.u32 2147483647, %v89_v32 }
  0xfe   :  { %v94_v33 = vpop.xlane.xlu0 %93 }
  0xff   :  { %v116_v57 = vor.u32 1.1754944e-38, %v115_v47  ;;  %vm114_vm6 = vcmp.eq.f32.partialorder %v113_v49, 8.507059e+37  ;;  %v103_v61 = vmul.f32 0.2, %v94_v33 }
 0x102   :  { %v68_v34 = vpop.xlane.xlu2 %67 }
 0x103   :  { %v200_v35 = vpop.eup %199  ;;  %201 = vlog2.f32 %v68_v34 }
 0x104   :  { %v105_v36 = vmul.f32 %v200_v35, %v89_v32  ;;  %203 = vlog2.f32 %v89_v32  ;;  %vm110_vm3 = vweird.f32 %v200_v35 }
 0x105   :  { %vm111_vm5 = vmor %vm109_vm4, %vm110_vm3 }
 0x106   :  { %v59_v37 = vpop.xlane.xlu0 %58  ;;  %v106_v38 = vsub.f32 1.0, %v105_v36 }
 0x107   :  { %v133_v39 = vsel %vm121_vm2, %v59_v37, 0.0 }
 0x108   :  { %134 = vadd.xlane.f32.xlu0 %v133_v39  ;;  %v107_v42 = vmul.f32 %v200_v35, %v106_v38 }
 0x109   :  { %v202_v40 = vpop.eup %201 }
 0x10a   :  { %v79_v41 = vpop.xlane.xlu2 %78  ;;  %v70_v43 = vmul.f32 0.6931472, %v202_v40  ;;  %v204_v44 = vpop.eup %203  ;;  %v108_v46 = vadd.f32 %v200_v35, %v107_v42 }
 0x10b   :  { %205 = vlog2.f32 %v79_v41  ;;  %v98_v50 = vmul.f32 0.6931472, %v204_v44 }
 0x10c   :  { %v71_v51 = vadd.f32 %v70_v43, %v62_v10  ;;  %v112_v54 = vsel %vm111_vm5, %v200_v35, %v108_v46 }
 0x10d   :  { %v99_v58 = vadd.f32 %v98_v50, %v96_v53  ;;  %v117_v60 = vsel %vm114_vm6, %v116_v57, %v112_v54 }
 0x10e   :  { %v118_v0 = vmul.f32 %v117_v60, %v103_v61 }
 0x111   :  { %v206_v48 = vpop.eup %205 }
 0x112   :  { %v52_v52 = vpop.xlane.xlu2 %51  ;;  %v101_v55 = vmul.f32 0.6931472, %v206_v48 }
 0x113   :  { %v72_v56 = vsub.f32 %v71_v51, %v52_v52 }
 0x114   :  { %v102_v62 = vsub.f32 %v99_v58, %v101_v55 }
 0x115   :  { %v73_v59 = vmul.f32 %v72_v56, %v59_v37 }
 0x116   :  { %v119_v1 = vsub.f32 %v118_v0, %v102_v62 }
 0x117   :  { %v122_v63 = vsel %vm121_vm2, %v73_v59, 0.0 }
 0x118   :  { %123 = vadd.xlane.f32.xlu2 %v122_v63  ;;  %v144_v2 = vsel %vm121_vm2, %v119_v1, 0.0 }
 0x120   :  { %145 = vadd.xlane.f32.xlu2 %v144_v2 }
 0x17b   :  { %v135_v3 = vpop.xlane.xlu0 %134 }
 0x17c   :  { %v136_v4 = vrot.slane %v135_v3, 4 }
 0x17e   :  { %v137_v5 = vadd.f32 %v136_v4, %v135_v3 }
 0x180   :  { %v138_v6 = vrot.slane %v137_v5, 2 }
 0x182   :  { %v139_v10 = vadd.f32 %v138_v6, %v137_v5 }
 0x184   :  { %v140_v14 = vrot.slane %v139_v10, 1 }
 0x186   :  { %v141_v20 = vadd.f32 %v140_v14, %v139_v10 }
 0x18b   :  { %v124_v7 = vpop.xlane.xlu2 %123 }
 0x18c   :  { %v125_v8 = vrot.slane %v124_v7, 4 }
 0x18e   :  { %v126_v9 = vadd.f32 %v125_v8, %v124_v7 }
 0x190   :  { %v127_v11 = vrot.slane %v126_v9, 2 }
 0x192   :  { %v128_v12 = vadd.f32 %v127_v11, %v126_v9 }
 0x193   :  { %v146_v13 = vpop.xlane.xlu2 %145 }
 0x194   :  { %v147_v15 = vrot.slane %v146_v13, 4  ;;  %v129_v17 = vrot.slane %v128_v12, 1 }
 0x196   :  { %v148_v18 = vadd.f32 %v147_v15, %v146_v13  ;;  %v130_v19 = vadd.f32 %v129_v17, %v128_v12 }
 0x198   :  { %v149_v21 = vrot.slane %v148_v18, 2  ;;  %181 = vpush %v130_v19 }
 0x199   :  { %183 = vpush %v141_v20 }
 0x19a   :  { %v150_v22 = vadd.f32 %v149_v21, %v148_v18 }
 0x19c   :  { %v151_v23 = vrot.slane %v150_v22, 1 }
 0x19e   :  { %v152_v24 = vadd.f32 %v151_v23, %v150_v22 }
 0x1a0   :  { %185 = vpush %v152_v24 }
 0x1c9   :  { %s182_s3 = spop %181 }
 0x1ca   :  { %s184_s23 = spop %183  ;;  %v161_v28 = vstv %s182_s3 }
 0x1cb   :  { %v159_v26 = vstv %s184_s23 }
 0x1d1   :  { %s186_s26 = spop %185 }
 0x1d2   :  { %v157_v25 = vstv %s186_s26 }
 0x1d3   :  { %v158_v27 = vsel %vm156_vm7, %v157_v25, 0.0 }
 0x1d4   :  { %v160_v29 = vsel %vm155_vm8, %v159_v26, %v158_v27 }
 0x1d5   :  { %v162_v30 = vsel %vm154_vm9, %v161_v28, %v160_v29 }
 0x1d6   :  { %163 = vst [vmem:[#allocation5] sm:$0xff] %v162_v30 }
 0x1d7   :  { %174 = dma.vmem_to_hbm [thread:$0]  %s170_s25, 128, %s172_s29, [#allocation4]  }
 0x1d8   :  { %257 = dma.done.wait [#allocation4], 128  }
 0x1d9   :  { %258 = vsyncadd [#allocation4], 4294967168 }
 0x1da   :  { %179 = vsyncpa [#allocation3], 1 }
 0x1db   :  { %180 = vsyncpa [#allocation4], 1 }

</bundles_post_ra>
